<compile_context>
chip_gen: v6e
topology: v6e:2x2x1
jax: 0.10.0
libtpu: 0.0.40
codegen_flags: <defaults>
</compile_context>

<pallas_src>
import jax
import jax.numpy as jnp
from jax.experimental import pallas as pl
from jax.experimental.pallas import tpu as pltpu

_LANES = 128


def _uncertainty_reg_loss_kernel(pred_ref, target_ref, unc_ref, out_ref):
    # Compute in f32 regardless of storage dtype; cast on store.
    pred = pred_ref[...].astype(jnp.float32)
    target = target_ref[...].astype(jnp.float32)
    unc = unc_ref[...].astype(jnp.float32)
    reg_loss = jnp.abs(pred - target)                      # L1, reduction='none'
    out = reg_loss * jnp.exp(-unc) + 0.5 * unc             # uncertainty re-weighting
    out_ref[...] = out.astype(out_ref.dtype)


def uncertainty_reg_loss(pred, target, uncertainty, *, block_rows=2048):
    """Elementwise uncertainty-weighted regression loss (no reduction).

    Works for arbitrary input shapes; flattens to a lane-dense (rows, 128) slab,
    pads at most 127 elements, and tiles with large blocks for HBM-roofline DMA.
    """
    assert pred.shape == target.shape == uncertainty.shape
    orig_shape = pred.shape
    out_dtype = pred.dtype
    n = pred.size

    p = pred.reshape(-1)
    t = target.reshape(-1)
    u = uncertainty.reshape(-1)

    rows = pl.cdiv(n, _LANES)
    padded = rows * _LANES
    if padded != n:
        pad = padded - n
        p = jnp.pad(p, (0, pad))
        t = jnp.pad(t, (0, pad))
        u = jnp.pad(u, (0, pad))

    p2 = p.reshape(rows, _LANES)
    t2 = t.reshape(rows, _LANES)
    u2 = u.reshape(rows, _LANES)

    # Small inputs: one full-array block; large inputs: big tiles + cdiv tail.
    br = min(block_rows, rows)
    grid = (pl.cdiv(rows, br),)

    spec = pl.BlockSpec((br, _LANES), lambda i: (i, 0))
    out2 = pl.pallas_call(
        _uncertainty_reg_loss_kernel,
        out_shape=jax.ShapeDtypeStruct((rows, _LANES), out_dtype),
        grid_spec=pltpu.PrefetchScalarGridSpec(
            num_scalar_prefetch=0,
            grid=grid,
            in_specs=[spec, spec, spec],
            out_specs=spec,
        ),
        compiler_params=pltpu.CompilerParams(
            dimension_semantics=("parallel",),   # shards across v7x's 2 TCs; neutral elsewhere
            vmem_limit_bytes=32 * 1024 * 1024,   # 8 MiB actually used; safe on v5e/v6e/v7x
        ),
    )(p2, t2, u2)

    out = out2.reshape(-1)
    if padded != n:
        out = out[:n]
    return out.reshape(orig_shape)


def _reference(pred, target, uncertainty):
    reg_loss = jnp.abs(pred - target)
    return reg_loss * jnp.exp(-uncertainty) + 0.5 * uncertainty


if __name__ == "__main__":
    key = jax.random.PRNGKey(0)
    k1, k2, k3 = jax.random.split(key, 3)

    # Primary demo: NCHW inputs, batch=2, channels=4, spatial=16.
    shape = (2, 4, 16, 16)
    pred = jax.random.normal(k1, shape, dtype=jnp.float32)
    target = jax.random.normal(k2, shape, dtype=jnp.float32)
    uncertainty = jax.random.normal(k3, shape, dtype=jnp.float32)

    out = jax.block_until_ready(uncertainty_reg_loss(pred, target, uncertainty))
    ref = _reference(pred, target, uncertainty)
    assert out.shape == shape
    assert jnp.allclose(out, ref, atol=1e-5, rtol=1e-5), "mismatch vs reference (primary)"

    # Robustness checks: (a) element count not a multiple of 128 (padding path),
    # (b) a larger input that exercises the multi-block tiled path.
    for extra_shape, br in (((2, 3, 7, 5), 2048), ((4, 16, 128, 128), 512)):
        ka, kb, kc = jax.random.split(jax.random.fold_in(key, extra_shape[-1]), 3)
        pe = jax.random.normal(ka, extra_shape, dtype=jnp.float32)
        te = jax.random.normal(kb, extra_shape, dtype=jnp.float32)
        ue = jax.random.normal(kc, extra_shape, dtype=jnp.float32)
        oe = jax.block_until_ready(uncertainty_reg_loss(pe, te, ue, block_rows=br))
        re = _reference(pe, te, ue)
        assert oe.shape == extra_shape
        assert jnp.allclose(oe, re, atol=1e-5, rtol=1e-5), f"mismatch vs reference {extra_shape}"

    print("KERNEL_OK")
</pallas_src>

<mosaic_0001>
module attributes {stable_mosaic.version = 11 : i64} {
  func.func @_uncertainty_reg_loss_kernel(%arg0: i32, %arg1: memref<16x128xf32, #tpu.memory_space<vmem>>, %arg2: memref<16x128xf32, #tpu.memory_space<vmem>>, %arg3: memref<16x128xf32, #tpu.memory_space<vmem>>, %arg4: memref<16x128xf32, #tpu.memory_space<vmem>>) attributes {dimension_semantics = [#tpu.dimension_semantics<parallel>], iteration_bounds = array<i64: 1>, scalar_prefetch = 0 : i64, scratch_operands = 0 : i64, tpu.core_type = #tpu.core_type<tc>, window_params = [{transform_indices = @transform_0, window_bounds = array<i64: 16, 128>}, {transform_indices = @transform_1, window_bounds = array<i64: 16, 128>}, {transform_indices = @transform_2, window_bounds = array<i64: 16, 128>}, {transform_indices = @transform_3, window_bounds = array<i64: 16, 128>}]} {
    %c0 = arith.constant 0 : index
    %c0_0 = arith.constant 0 : index
    %0 = vector.load %arg1[%c0, %c0_0] : memref<16x128xf32, #tpu.memory_space<vmem>>, vector<16x128xf32>
    %c0_1 = arith.constant 0 : index
    %c0_2 = arith.constant 0 : index
    %1 = vector.load %arg2[%c0_1, %c0_2] : memref<16x128xf32, #tpu.memory_space<vmem>>, vector<16x128xf32>
    %c0_3 = arith.constant 0 : index
    %c0_4 = arith.constant 0 : index
    %2 = vector.load %arg3[%c0_3, %c0_4] : memref<16x128xf32, #tpu.memory_space<vmem>>, vector<16x128xf32>
    %3 = arith.subf %0, %1 : vector<16x128xf32>
    %4 = math.absf %3 : vector<16x128xf32>
    %cst = arith.constant 0.000000e+00 : f32
    %5 = vector.broadcast %cst : f32 to vector<16x128xf32>
    %6 = arith.subf %5, %2 : vector<16x128xf32>
    %7 = math.exp %6 : vector<16x128xf32>
    %8 = arith.mulf %4, %7 : vector<16x128xf32>
    %cst_5 = arith.constant 5.000000e-01 : f32
    %9 = vector.broadcast %cst_5 : f32 to vector<16x128xf32>
    %10 = arith.mulf %9, %2 : vector<16x128xf32>
    %11 = arith.addf %8, %10 : vector<16x128xf32>
    %c0_6 = arith.constant 0 : index
    %c0_7 = arith.constant 0 : index
    %12 = vector.load %arg4[%c0_6, %c0_7] : memref<16x128xf32, #tpu.memory_space<vmem>>, vector<16x128xf32>
    tpu.vector_store %arg4[%c0_6, %c0_7], %11 {strides = array<i32>} : memref<16x128xf32, #tpu.memory_space<vmem>>, vector<16x128xf32>,
    return
  }
  func.func @transform_0(%arg0: i32) -> (i32, i32) {
    %c0_i32 = arith.constant 0 : i32
    %c0_i32_0 = arith.constant 0 : i32
    return %arg0, %c0_i32 : i32, i32
  }
  func.func @transform_1(%arg0: i32) -> (i32, i32) {
    %c0_i32 = arith.constant 0 : i32
    %c0_i32_0 = arith.constant 0 : i32
    return %arg0, %c0_i32 : i32, i32
  }
  func.func @transform_2(%arg0: i32) -> (i32, i32) {
    %c0_i32 = arith.constant 0 : i32
    %c0_i32_0 = arith.constant 0 : i32
    return %arg0, %c0_i32 : i32, i32
  }
  func.func @transform_3(%arg0: i32) -> (i32, i32) {
    %c0_i32 = arith.constant 0 : i32
    %c0_i32_0 = arith.constant 0 : i32
    return %arg0, %c0_i32 : i32, i32
  }
}

</mosaic_0001>

<bundles_post_ra>
// kernel: tpu_custom_call.1
= control target key start
LH: loop header
LB: loop body
LE: loop exit
PB: predicated region body
PF: predicated region fallthrough
CT: control target
= control target key end

     0   :  { %8 = vsyncpa [#allocation3], 0  ;;  %s244_s0 = inlined_call_operand.hbm [shape: f32[16,128], index: 0, kind: input, shape index: {}]   ;;  %s245_s1 = inlined_call_operand.hbm [shape: f32[16,128], index: 1, kind: input, shape index: {}]   ;;  %s246_s2 = inlined_call_operand.hbm [shape: f32[16,128], index: 2, kind: input, shape index: {}]   ;;  %s247_s3 = inlined_call_operand.hbm [shape: f32[16,128], index: 3, kind: output, shape index: {}]  }
   0x1   :  { %9 = vsyncpa [#allocation6], 0 }
   0x2   :  { %10 = vsyncpa [#allocation4], 0  ;;  %s194_s12 = smov [#allocation5]   ;;  %s195_s14 = smov [#allocation2]  }
   0x3   :  { %s28_s13 = sshll.u32 %s194_s12, 4  ;;  %s16_s15 = sshll.u32 %s195_s14, 4  ;;  %s29_s13 = int_to_ptr.vmem [resolvable:$true] %s28_s13  ;;  %s17_s15 = int_to_ptr.vmem [resolvable:$true] %s16_s15 }
   0x4   :  { %s116_s16 = scalar_lea.vmem %s29_s13, 256  ;;  %p121_p1 = scmp.lt.s32.totalorder %s29_s13, %s29_s13 }
   0x5   :  { %p117_p0 = scmp.ne.s32.totalorder %s29_s13, %s116_s16  ;;  %p122_p2 = scmp.lt.s32.totalorder %s116_s16, %s116_s16 }
   0x7   :  { %p123_p3 = por %p122_p2, %p121_p1 }
   0x9   :  { %p124_p4 = pnand %p123_p3, %p117_p0 }
   0xb   :  { %127 = shalt.err (!%p124_p4)
}
   0xc   :  { %s196_s17 = smov 128   ;;  %s197_s18 = smov 8  }
   0xd   :  { %34 = dma.hbm_to_vmem [thread:$0]  %s245_s1, 256, %s29_s13, [#allocation6], %s196_s17, %s196_s17, %s197_s18  }
   0xe   :  { %s136_s21 = scalar_lea.vmem %s17_s15, 256  ;;  %p141_p6 = scmp.lt.s32.totalorder %s17_s15, %s17_s15 }
   0xf   :  { %p137_p5 = scmp.ne.s32.totalorder %s17_s15, %s136_s21  ;;  %p142_p7 = scmp.lt.s32.totalorder %s136_s21, %s136_s21 }
  0x11   :  { %p143_p8 = por %p142_p7, %p141_p6 }
  0x13   :  { %p144_p9 = pnand %p143_p8, %p137_p5 }
  0x15   :  { %147 = shalt.err (!%p144_p9)
}
  0x16   :  { %22 = dma.hbm_to_vmem [thread:$0]  %s244_s0, 256, %s17_s15, [#allocation3], %s196_s17, %s196_s17, %s197_s18  }
  0x17   :  { %s198_s24 = smov [#allocation7]  }
  0x18   :  { %s40_s25 = sshll.u32 %s198_s24, 4  ;;  %s41_s25 = int_to_ptr.vmem [resolvable:$true] %s40_s25 }
  0x19   :  { %s156_s26 = scalar_lea.vmem %s41_s25, 256  ;;  %p161_p11 = scmp.lt.s32.totalorder %s41_s25, %s41_s25 }
  0x1a   :  { %p157_p10 = scmp.ne.s32.totalorder %s41_s25, %s156_s26  ;;  %p162_p12 = scmp.lt.s32.totalorder %s156_s26, %s156_s26 }
  0x1c   :  { %p163_p13 = por %p162_p12, %p161_p11 }
  0x1e   :  { %p164_p0 = pnand %p163_p13, %p157_p10 }
  0x20   :  { %167 = shalt.err (!%p164_p0)
}
  0x21   :  { %46 = dma.hbm_to_vmem [thread:$0]  %s246_s2, 256, %s41_s25, [#allocation6], %s196_s17, %s196_s17, %s197_s18  }
  0x22   :  { %188 = dma.done.wait [#allocation3], 256  }
  0x23   :  { %189 = vsyncadd [#allocation3], 4294967040 }
  0x24   :  { %190 = dma.done.wait [#allocation6], 512  }
  0x25   :  { %191 = vsyncadd [#allocation6], 4294966784  ;;  %v60_v0 = vld [vmem:[#allocation7] sm:$0xff]  ;;  %v61_v2 = vld [vmem:[#allocation7 + $0x8] sm:$0xff]  ;;  %s199_s0 = smov [#allocation8]  }
  0x26   :  { %v66_v1 = vsub.f32 0.0, %v60_v0  ;;  %v67_v3 = vsub.f32 0.0, %v61_v2  ;;  %v56_v6 = vld [vmem:[#allocation2] sm:$0xff]  ;;  %v58_v7 = vld [vmem:[#allocation5] sm:$0xff]  ;;  %v57_v8 = vld [vmem:[#allocation2 + $0x8] sm:$0xff]  ;;  %v74_v14 = vmul.f32 0.5, %v60_v0 }
  0x27   :  { %v59_v9 = vld [vmem:[#allocation5 + $0x8] sm:$0xff]  ;;  %v62_v10 = vsub.f32 %v56_v6, %v58_v7  ;;  %v75_v16 = vmul.f32 0.5, %v61_v2  ;;  %s85_s2 = sshll.u32 %s199_s0, 4  ;;  %s86_s2 = int_to_ptr.vmem [resolvable:$true] %s85_s2 }
  0x28   :  { %v68_v4 = vmul.f32 1.442695, %v66_v1  ;;  %v70_v5 = vmul.f32 1.442695, %v67_v3  ;;  %v63_v11 = vsub.f32 %v57_v8, %v59_v9  ;;  %s168_s28 = scalar_lea.vmem %s86_s2, 256  ;;  %p173_p2 = scmp.lt.s32.totalorder %s86_s2, %s86_s2 }
  0x29   :  { %v64_v12 = vand.u32 2147483647, %v62_v10  ;;  %p169_p1 = scmp.ne.s32.totalorder %s86_s2, %s168_s28  ;;  %p174_p3 = scmp.lt.s32.totalorder %s168_s28, %s168_s28 }
  0x2a   :  { %104 = vpow2.f32 %v68_v4  ;;  %v65_v13 = vand.u32 2147483647, %v63_v11 }
  0x2b   :  { %106 = vpow2.f32 %v70_v5  ;;  %p175_p4 = por %p174_p3, %p173_p2 }
  0x2d   :  { %p176_p5 = pnand %p175_p4, %p169_p1 }
  0x37   :  { %v105_v15 = vpop.eup %104 }
  0x38   :  { %v107_v17 = vpop.eup %106  ;;  %v72_v18 = vmul.f32 %v105_v15, %v64_v12 }
  0x39   :  { %v73_v19 = vmul.f32 %v107_v17, %v65_v13 }
  0x3a   :  { %v76_v20 = vadd.f32 %v74_v14, %v72_v18 }
  0x3b   :  { %v77_v21 = vadd.f32 %v75_v16, %v73_v19 }
  0x3c   :  { %78 = vst [vmem:[#allocation8] sm:$0xff] %v76_v20 }
  0x3d   :  { %79 = vst [vmem:[#allocation8 + $0x8] sm:$0xff] %v77_v21 }
  0x3e   :  { %179 = shalt.err (!%p176_p5)
}
  0x3f   :  { %91 = dma.vmem_to_hbm [thread:$0]  %s86_s2, 256, %s247_s3, [#allocation4], %s196_s17, %s196_s17, %s197_s18  }
  0x40   :  { %192 = dma.done.wait [#allocation4], 256  }
  0x41   :  { %193 = vsyncadd [#allocation4], 4294967040 }
  0x42   :  { %95 = vsyncpa [#allocation3], 1 }
  0x43   :  { %96 = vsyncpa [#allocation6], 1 }
  0x44   :  { %97 = vsyncpa [#allocation4], 1 }

</bundles_post_ra>
